<compile_context>
chip_gen: v6e
topology: v6e:2x2x1
jax: 0.10.0
libtpu: 0.0.40
codegen_flags: <defaults>
</compile_context>

<pallas_src>
import functools

import numpy as np
import jax
import jax.numpy as jnp
from jax.experimental import pallas as pl
from jax.experimental.pallas import tpu as pltpu


# ------------- sincos positional embedding (pure numpy, matches PyTorch ref) -------------
def get_1d_sincos_pos_embed_from_grid(embed_dim, pos):
    assert embed_dim % 2 == 0
    omega = np.arange(embed_dim // 2, dtype=np.float64)
    omega /= embed_dim / 2.0
    omega = 1.0 / 10000 ** omega
    pos = pos.reshape(-1)
    out = np.einsum('m,d->md', pos, omega)
    emb_sin = np.sin(out)
    emb_cos = np.cos(out)
    return np.concatenate([emb_sin, emb_cos], axis=1)


def get_3d_sincos_pos_embed_from_grid(embed_dim, grid):
    spacial_embed_dim = embed_dim // 6 * 2
    emb_f = get_1d_sincos_pos_embed_from_grid(embed_dim - spacial_embed_dim * 2, grid[0])
    emb_h = get_1d_sincos_pos_embed_from_grid(spacial_embed_dim, grid[1])
    emb_w = get_1d_sincos_pos_embed_from_grid(spacial_embed_dim, grid[2])
    return np.concatenate([emb_f, emb_h, emb_w], axis=1)


def get_3d_sincos_pos_embed(embed_dim, frame_grid_size, grid_size):
    # NOTE: like the PyTorch reference, this assumes nh == nw.
    grid_f = np.arange(frame_grid_size, dtype=np.float32)
    grid_h = np.arange(grid_size, dtype=np.float32)
    grid_w = np.arange(grid_size, dtype=np.float32)
    grid = np.meshgrid(grid_f, grid_h, grid_w)
    grid = np.stack(grid, axis=0)
    grid = grid.transpose(0, 2, 1, 3)
    return get_3d_sincos_pos_embed_from_grid(embed_dim, grid)


def _round_up(x, m):
    return (x + m - 1) // m * m


# ------------------------------------ Pallas kernel ----------------------------------------
def _video_embed_kernel(x_ref, w_ref, b_ref, g_ref, pe_ref, o_ref, *, inv_d):
    # x_ref:  (1, TL, K)  bf16  patch rows for one (row-tile, batch)
    # w_ref:  (K, Dp)     bf16  conv weight (D zero-padded to Dp), grid-invariant
    # b_ref:  (1, Dp)     f32   conv bias (zero-padded)
    # g_ref:  (1, Dp)     f32   LayerNorm gamma (zero-padded)
    # pe_ref: (TL, Dp)    bf16  pos-embed + LN beta (zero-padded); constant across batch steps
    # o_ref:  (1, TL, Dp) f32   output tile (lane-dense, Dp % 128 == 0)
    x = x_ref[0]                                                      # (TL, K) bf16
    y = jnp.dot(x, w_ref[...], preferred_element_type=jnp.float32)   # (TL, Dp) MXU, f32 acc
    y = y + b_ref[...]

    # LayerNorm over the true D (eps = 1e-5, biased variance — torch.nn.LayerNorm).
    # Padded columns of y are exactly zero (zero-padded weight/bias), so they add
    # nothing to the sums; one-pass stats with a non-negativity clamp on var.
    row_sum = jnp.sum(y, axis=-1, keepdims=True)
    row_sumsq = jnp.sum(y * y, axis=-1, keepdims=True)
    mean = row_sum * inv_d
    var = jnp.maximum(row_sumsq * inv_d - mean * mean, 0.0)
    y_norm = (y - mean) * jax.lax.rsqrt(var + 1e-5)

    # Padded gamma / pos columns are zero -> padded output columns are zero (sliced off).
    o_ref[0] = y_norm * g_ref[...] + pe_ref[...].astype(jnp.float32)


def _working_set_bytes(tl, K, Dp):
    """Conservative per-step VMEM working set, including compute temporaries."""
    x_b = 2 * tl * K * 2            # double-buffered x (bf16)
    pe_b = 2 * tl * Dp * 2          # double-buffered pos-embed (bf16)
    out_b = 2 * tl * Dp * 4         # double-buffered output (f32)
    tmp_b = 3 * tl * Dp * 4         # y / y*y / y_norm f32 temporaries
    const_b = K * Dp * 2 + 2 * (2 * Dp * 4)   # resident weight + bias/gamma
    return x_b + pe_b + out_b + tmp_b + const_b


def _pick_row_tile(L, K, Dp, B, budget_bytes=40 * 1024 * 1024):
    """Row tile (multiple of 8) that fits the VMEM budget, minimizes L-padding
    waste, and leaves >=2 grid steps so both v7x TensorCores get work."""
    L8 = _round_up(L, 8)
    cands = [t for t in (1024, 512, 256, 128, 64, 32, 16, 8)
             if t <= L8 and _working_set_bytes(t, K, Dp) <= budget_bytes]
    if not cands:
        tl = 8
    else:
        # Prefer the largest tile whose L-padding waste is small; otherwise fall
        # back to the minimal-waste candidate (ties -> larger tile).
        good = [t for t in cands if _round_up(L, t) - L <= max(L // 8, 8)]
        tl = good[0] if good else min(cands, key=lambda t: (_round_up(L, t) - L, -t))
    # v7x megacore: guarantee >=2 grid steps when possible.
    while tl > 8 and B * (_round_up(L, tl) // tl) < 2:
        tl //= 2
    return tl


def video_embedder_pallas(xp, w, b, gamma, pe, *, d_true, tl):
    """xp: (B, Lp, K) bf16; w: (K, Dp) bf16; b/gamma: (1, Dp) f32; pe: (Lp, Dp) bf16."""
    B, Lp, K = xp.shape
    Dp = w.shape[1]
    grid = (Lp // tl, B)   # batch innermost -> pos-embed tile reused across batch
    kernel = functools.partial(_video_embed_kernel, inv_d=np.float32(1.0 / d_true))
    return pl.pallas_call(
        kernel,
        out_shape=jax.ShapeDtypeStruct((B, Lp, Dp), jnp.float32),
        grid_spec=pltpu.PrefetchScalarGridSpec(
            num_scalar_prefetch=0,
            grid=grid,
            in_specs=[
                pl.BlockSpec((1, tl, K), lambda li, bi: (bi, li, 0)),   # x (K = full dim)
                pl.BlockSpec((K, Dp), lambda li, bi: (0, 0)),           # weight (grid-invariant)
                pl.BlockSpec((1, Dp), lambda li, bi: (0, 0)),           # bias
                pl.BlockSpec((1, Dp), lambda li, bi: (0, 0)),           # gamma
                pl.BlockSpec((tl, Dp), lambda li, bi: (li, 0)),         # pos-embed (+beta)
            ],
            out_specs=pl.BlockSpec((1, tl, Dp), lambda li, bi: (bi, li, 0)),
        ),
        compiler_params=pltpu.CompilerParams(
            dimension_semantics=("parallel", "parallel"),
            # 48 MiB: >=25% headroom under v7x's 64 MiB physical VMEM; v6e/v5e
            # (128 MiB physical) could go higher if bigger tiles ever help.
            vmem_limit_bytes=48 * 1024 * 1024,
        ),
    )(xp, w, b, gamma, pe)


# ------------------------------------- wrapper (glue) --------------------------------------
def patchify_ncdhw(x, patch_size):
    """(B, C, F, H, W) -> (B, L, K) matching Conv3d(k=stride=patch) + flatten order."""
    pf, ph, pw = patch_size
    B, C, F, H, W = x.shape
    nf, nh, nw = F // pf, H // ph, W // pw
    x = x.reshape(B, C, nf, pf, nh, ph, nw, pw)
    # -> (B, nf, nh, nw, C, pf, ph, pw)
    x = x.transpose(0, 2, 4, 6, 1, 3, 5, 7)
    return x.reshape(B, nf * nh * nw, C * pf * ph * pw)


def prepare_params(conv_w, conv_b, ln_gamma, ln_beta, pos_embed):
    """Reshape / zero-pad parameters; only the output dim D is padded to 128."""
    D = conv_w.shape[0]
    K = int(np.prod(conv_w.shape[1:]))
    Dp = _round_up(D, 128)
    w = conv_w.reshape(D, K).T                                            # (K, D) — K stays true
    w = jnp.pad(w, ((0, 0), (0, Dp - D))).astype(jnp.bfloat16)            # (K, Dp)
    b = jnp.pad(conv_b.reshape(1, D), ((0, 0), (0, Dp - D))).astype(jnp.float32)
    g = jnp.pad(ln_gamma.reshape(1, D), ((0, 0), (0, Dp - D))).astype(jnp.float32)
    pe = pos_embed + ln_beta.reshape(1, D)                                # fold LN beta into pos
    pe = jnp.pad(pe, ((0, 0), (0, Dp - D))).astype(jnp.bfloat16)          # (L, Dp) bf16
    return {"w": w, "b": b, "gamma": g, "pe": pe, "d_true": D, "k_true": K}


@functools.partial(jax.jit, static_argnames=("patch_size", "tl", "Lp", "d_true"))
def _forward_jit(x, w, b, gamma, pe, *, patch_size, tl, Lp, d_true):
    # bf16 first so the XLA-side patch-gather transpose + pad move half the bytes
    # and fuse under this jit.
    xp = patchify_ncdhw(x.astype(jnp.bfloat16), patch_size)    # (B, L, K) bf16
    B, L, K = xp.shape
    if Lp != L:
        xp = jnp.pad(xp, ((0, 0), (0, Lp - L), (0, 0)))
        pe = jnp.pad(pe, ((0, Lp - L), (0, 0)))
    out = video_embedder_pallas(xp, w, b, gamma, pe, d_true=d_true, tl=tl)
    return out[:, :L, :d_true]


def video_embedder_forward(x, params, patch_size):
    B, C, F, H, W = x.shape
    pf, ph, pw = patch_size
    L = (F // pf) * (H // ph) * (W // pw)
    K = C * pf * ph * pw
    Dp = params["w"].shape[1]
    tl = _pick_row_tile(L, K, Dp, B)
    Lp = _round_up(L, tl)
    return _forward_jit(x, params["w"], params["b"], params["gamma"], params["pe"],
                        patch_size=tuple(patch_size), tl=tl, Lp=Lp,
                        d_true=params["d_true"])


if __name__ == "__main__":
    # Small config consistent with the module
    dim = 48                       # divisible for 3D sincos split (48//6*2 = 16)
    image_size = (8, 16, 16)       # (F, H, W)
    patch_size = (2, 4, 4)
    in_channels = 3
    B = 2

    nf = image_size[0] // patch_size[0]
    nh = image_size[1] // patch_size[1]
    nw = image_size[2] // patch_size[2]
    L = nf * nh * nw                                                   # 64
    K = in_channels * patch_size[0] * patch_size[1] * patch_size[2]    # 96

    key = jax.random.PRNGKey(0)
    kx, kw, kb = jax.random.split(key, 3)

    # Deterministic synthetic parameters (shapes follow nn.Conv3d / nn.LayerNorm)
    conv_w = jax.random.normal(kw, (dim, in_channels, *patch_size), jnp.float32) * 0.02
    conv_b = jax.random.normal(kb, (dim,), jnp.float32) * 0.02
    ln_gamma = jnp.ones((dim,), jnp.float32)
    ln_beta = jnp.zeros((dim,), jnp.float32)
    pos_embed = jnp.asarray(get_3d_sincos_pos_embed(dim, nf, nh).astype(np.float32))  # (L, D)

    params = prepare_params(conv_w, conv_b, ln_gamma, ln_beta, pos_embed)

    x = jax.random.normal(kx, (B, in_channels, *image_size), jnp.float32)

    out = video_embedder_forward(x, params, patch_size)
    out = jax.block_until_ready(out)
    assert out.shape == (B, L, dim)
    assert bool(jnp.all(jnp.isfinite(out)))

    # Pure-JAX reference (same math; bf16-consistent inputs, f32 accumulation)
    xp = patchify_ncdhw(x, patch_size)
    xp_b = xp.astype(jnp.bfloat16).astype(jnp.float32)
    w_mat = conv_w.reshape(dim, K).T
    w_b = w_mat.astype(jnp.bfloat16).astype(jnp.float32)
    y = xp_b @ w_b + conv_b.reshape(1, 1, dim)
    mu = jnp.mean(y, axis=-1, keepdims=True)
    var = jnp.mean((y - mu) ** 2, axis=-1, keepdims=True)
    y_norm = (y - mu) / jnp.sqrt(var + 1e-5) * ln_gamma

    # Kernel stores (pos_embed + beta) in bf16 — tight check against that path,
    # plus a looser check against the pure-f32 module math (documented deviation).
    pe_bf = (pos_embed + ln_beta.reshape(1, dim)).astype(jnp.bfloat16).astype(jnp.float32)
    ref_bf16_pe = y_norm + pe_bf[None]
    ref_f32 = y_norm + ln_beta + pos_embed[None]

    assert jnp.allclose(out, ref_bf16_pe, atol=2e-3, rtol=2e-3), \
        float(jnp.max(jnp.abs(out - ref_bf16_pe)))
    assert jnp.allclose(out, ref_f32, atol=8e-3, rtol=8e-3), \
        float(jnp.max(jnp.abs(out - ref_f32)))

    print("KERNEL_OK")
</pallas_src>

<mosaic_0001>
module attributes {stable_mosaic.version = 11 : i64} {
  func.func @_video_embed_kernel(%arg0: i32, %arg1: i32, %arg2: memref<1x64x96xbf16, #tpu.memory_space<vmem>>, %arg3: memref<96x128xbf16, #tpu.memory_space<vmem>>, %arg4: memref<1x128xf32, #tpu.memory_space<vmem>>, %arg5: memref<1x128xf32, #tpu.memory_space<vmem>>, %arg6: memref<64x128xbf16, #tpu.memory_space<vmem>>, %arg7: memref<1x64x128xf32, #tpu.memory_space<vmem>>) attributes {dimension_semantics = [#tpu.dimension_semantics<parallel>, #tpu.dimension_semantics<parallel>], iteration_bounds = array<i64: 1, 2>, scalar_prefetch = 0 : i64, scratch_operands = 0 : i64, tpu.core_type = #tpu.core_type<tc>, window_params = [{transform_indices = @transform_0, window_bounds = array<i64: 1, 64, 96>}, {pipeline_mode = #tpu.pipeline_mode<synchronous>, transform_indices = @transform_1, window_bounds = array<i64: 96, 128>}, {pipeline_mode = #tpu.pipeline_mode<synchronous>, transform_indices = @transform_2, window_bounds = array<i64: 1, 128>}, {pipeline_mode = #tpu.pipeline_mode<synchronous>, transform_indices = @transform_3, window_bounds = array<i64: 1, 128>}, {transform_indices = @transform_4, window_bounds = array<i64: 64, 128>}, {transform_indices = @transform_5, window_bounds = array<i64: 1, 64, 128>}]} {
    %c0 = arith.constant 0 : index
    %c0_0 = arith.constant 0 : index
    %c0_1 = arith.constant 0 : index
    %0 = vector.load %arg2[%c0, %c0_0, %c0_1] : memref<1x64x96xbf16, #tpu.memory_space<vmem>>, vector<1x64x96xbf16>
    %1 = vector.shape_cast %0 : vector<1x64x96xbf16> to vector<64x96xbf16>
    %c0_2 = arith.constant 0 : index
    %c0_3 = arith.constant 0 : index
    %2 = vector.load %arg3[%c0_2, %c0_3] : memref<96x128xbf16, #tpu.memory_space<vmem>>, vector<96x128xbf16>
    %cst = arith.constant dense<0.000000e+00> : vector<64x128xf32>
    %3 = tpu.matmul %1, %2, %cst {dimension_numbers = #tpu.dot_dimension_numbers<[1], [0], [0], [1], [0, 0, 1, 1], [], []>} : vector<64x96xbf16>, vector<96x128xbf16>, vector<64x128xf32> -> vector<64x128xf32>
    %c0_4 = arith.constant 0 : index
    %c0_5 = arith.constant 0 : index
    %4 = vector.load %arg4[%c0_4, %c0_5] : memref<1x128xf32, #tpu.memory_space<vmem>>, vector<1x128xf32>
    %5 = vector.broadcast %4 : vector<1x128xf32> to vector<64x128xf32>
    %6 = arith.addf %3, %5 : vector<64x128xf32>
    %cst_6 = arith.constant dense<0.000000e+00> : vector<64xf32>
    %7 = vector.multi_reduction <add>, %6, %cst_6 [1] : vector<64x128xf32> to vector<64xf32>
    %8 = vector.shape_cast %7 : vector<64xf32> to vector<64x1xf32>
    %9 = arith.mulf %6, %6 : vector<64x128xf32>
    %cst_7 = arith.constant dense<0.000000e+00> : vector<64xf32>
    %10 = vector.multi_reduction <add>, %9, %cst_7 [1] : vector<64x128xf32> to vector<64xf32>
    %11 = vector.shape_cast %10 : vector<64xf32> to vector<64x1xf32>
    %cst_8 = arith.constant 0.020833334 : f32
    %12 = vector.broadcast %cst_8 : f32 to vector<64x1xf32>
    %13 = arith.mulf %8, %12 : vector<64x1xf32>
    %cst_9 = arith.constant 0.020833334 : f32
    %14 = vector.broadcast %cst_9 : f32 to vector<64x1xf32>
    %15 = arith.mulf %11, %14 : vector<64x1xf32>
    %16 = arith.mulf %13, %13 : vector<64x1xf32>
    %17 = arith.subf %15, %16 : vector<64x1xf32>
    %cst_10 = arith.constant 0.000000e+00 : f32
    %18 = vector.broadcast %cst_10 : f32 to vector<64x1xf32>
    %19 = arith.maximumf %17, %18 : vector<64x1xf32>
    %20 = vector.broadcast %13 : vector<64x1xf32> to vector<64x128xf32>
    %21 = arith.subf %6, %20 : vector<64x128xf32>
    %cst_11 = arith.constant 9.99999974E-6 : f32
    %22 = vector.broadcast %cst_11 : f32 to vector<64x1xf32>
    %23 = arith.addf %19, %22 : vector<64x1xf32>
    %24 = math.rsqrt %23 : vector<64x1xf32>
    %25 = vector.broadcast %24 : vector<64x1xf32> to vector<64x128xf32>
    %26 = arith.mulf %21, %25 : vector<64x128xf32>
    %c0_12 = arith.constant 0 : index
    %c0_13 = arith.constant 0 : index
    %27 = vector.load %arg5[%c0_12, %c0_13] : memref<1x128xf32, #tpu.memory_space<vmem>>, vector<1x128xf32>
    %28 = vector.broadcast %27 : vector<1x128xf32> to vector<64x128xf32>
    %29 = arith.mulf %26, %28 : vector<64x128xf32>
    %c0_14 = arith.constant 0 : index
    %c0_15 = arith.constant 0 : index
    %30 = vector.load %arg6[%c0_14, %c0_15] : memref<64x128xbf16, #tpu.memory_space<vmem>>, vector<64x128xbf16>
    %31 = arith.extf %30 : vector<64x128xbf16> to vector<64x128xf32>
    %32 = arith.addf %29, %31 : vector<64x128xf32>
    %c0_16 = arith.constant 0 : index
    %c0_17 = arith.constant 0 : index
    %c0_18 = arith.constant 0 : index
    %33 = vector.load %arg7[%c0_16, %c0_17, %c0_18] : memref<1x64x128xf32, #tpu.memory_space<vmem>>, vector<1x64x128xf32>
    %34 = vector.shape_cast %33 : vector<1x64x128xf32> to vector<64x128xf32>
    %35 = vector.shape_cast %32 : vector<64x128xf32> to vector<1x64x128xf32>
    tpu.vector_store %arg7[%c0_16, %c0_17, %c0_18], %35 {strides = array<i32>} : memref<1x64x128xf32, #tpu.memory_space<vmem>>, vector<1x64x128xf32>,
    return
  }
  func.func @transform_0(%arg0: i32, %arg1: i32) -> (i32, i32, i32) {
    %c0_i32 = arith.constant 0 : i32
    %c0_i32_0 = arith.constant 0 : i32
    return %arg1, %arg0, %c0_i32 : i32, i32, i32
  }
  func.func @transform_1(%arg0: i32, %arg1: i32) -> (i32, i32) {
    %c0_i32 = arith.constant 0 : i32
    %c0_i32_0 = arith.constant 0 : i32
    %c0_i32_1 = arith.constant 0 : i32
    return %c0_i32, %c0_i32_0 : i32, i32
  }
  func.func @transform_2(%arg0: i32, %arg1: i32) -> (i32, i32) {
    %c0_i32 = arith.constant 0 : i32
    %c0_i32_0 = arith.constant 0 : i32
    %c0_i32_1 = arith.constant 0 : i32
    return %c0_i32, %c0_i32_0 : i32, i32
  }
  func.func @transform_3(%arg0: i32, %arg1: i32) -> (i32, i32) {
    %c0_i32 = arith.constant 0 : i32
    %c0_i32_0 = arith.constant 0 : i32
    %c0_i32_1 = arith.constant 0 : i32
    return %c0_i32, %c0_i32_0 : i32, i32
  }
  func.func @transform_4(%arg0: i32, %arg1: i32) -> (i32, i32) {
    %c0_i32 = arith.constant 0 : i32
    %c0_i32_0 = arith.constant 0 : i32
    return %arg0, %c0_i32 : i32, i32
  }
  func.func @transform_5(%arg0: i32, %arg1: i32) -> (i32, i32, i32) {
    %c0_i32 = arith.constant 0 : i32
    %c0_i32_0 = arith.constant 0 : i32
    return %arg1, %arg0, %c0_i32 : i32, i32, i32
  }
}

</mosaic_0001>

<bundles_post_ra>
// kernel: _forward_jit.1
= control target key start
LH: loop header
LB: loop body
LE: loop exit
PB: predicated region body
PF: predicated region fallthrough
CT: control target
= control target key end

     0   :  { %s904_s18 = smov 0   ;;  %s906_s19 = smov 0   ;;  %s1079_s0 = inlined_call_operand.vmem [shape: bf16[2,64,96], index: 0, kind: input, shape index: {}]   ;;  %s1080_s1 = inlined_call_operand.vmem [shape: bf16[96,128], index: 1, kind: input, shape index: {}]   ;;  %s1081_s2 = inlined_call_operand.vmem [shape: f32[1,128], index: 2, kind: input, shape index: {}]   ;;  %s1082_s3 = inlined_call_operand.vmem [shape: f32[1,128], index: 3, kind: input, shape index: {}]   ;;  %s1083_s4 = inlined_call_operand.vmem [shape: bf16[64,128], index: 4, kind: input, shape index: {}]   ;;  %s1084_s5 = inlined_call_operand.vmem [shape: f32[2,64,128], index: 5, kind: output, shape index: {}]  }
   0x1   :  { %s908_s20 = smov 0  }
   0x2 LB: > { %s24_s21 = sadd.s32 1, %s868_s19  ;;  %p714_p0 = scmp.ge.s32.totalorder %s872_s20, 1  ;;  %s872_s20 = sphi %s908_s20, %s15_s20   ;;  %s868_s19 = sphi %s906_s19, %s1086_s19   ;;  %s864_s18 = sphi %s904_s18, %s1085_s18  }
   0x3   : > { %p25_p1 = scmp.ge.s32.totalorder %s24_s21, 2  ;;  %p219_p2 = scmp.lt.s32.totalorder %s872_s20, 3 }
   0x5   : > { %s1088_s21 = smov (%p25_p1, %s24_s21), 0  ;;  %p220_p3 = pnand %p714_p0, %p219_p2 }
   0x6   : > { %p261_p4 = scmp.lt.s32.totalorder (!%p220_p3), %s864_s18, 1 }
   0x7   : > { %223 = sbr.rel (%p220_p3) target bundleno = 428 (0x1ac), region = 40 }
   0xc   : > { %v824_v0 = vld [vmem:[%s1080_s1 + $0x28] sm:$0xff]   ;;  %v825_v1 = vld [vmem:[%s1080_s1 + $0x20] sm:$0xff]   ;;  %s1090_s18 = smov (!%p261_p4, %s864_s18), 1  ;;  %v826_v2 = vld [vmem:[%s1080_s1 + $0x18] sm:$0xff]   ;;  %vm370_vm0 = vcmask 785408  }
   0xd   : > { %768 = vmatprep.subr.bf16.mxu0 %v824_v0  ;;  %788 = vmatprep.subr.bf16.mxu1 %v824_v0  ;;  %s737_s28 = sshll.u32 %s1090_s18, 5  ;;  %v827_v5 = vld [vmem:[%s1080_s1 + $0x10] sm:$0xff]   ;;  %v828_v6 = vld [vmem:[%s1080_s1 + $0x8] sm:$0xff]   ;;  %v829_v7 = vld [vmem:[%s1080_s1] sm:$0xff]   ;;  %s738_s23 = sshll.u32 %s1090_s18, 6 }
   0xe   : > { %769 = vmatpush3.bf16.msra.mxu0 %v824_v0  ;;  %794 = vmatpush3.bf16.msra.mxu1 %v824_v0  ;;  %s268_s6 = scalar_lea.vmem %s1079_s0, %s737_s28  ;;  %v719_v10 = vld [vmem:[%s1081_s2] ss:$0 sm:$0xff]  ;;  %s1042_s28 = scalar_lea.vmem %s1084_s5, %s738_s23 }
   0xf   : > { %770 = vmatprep.subr.bf16.mxu0 %v825_v1  ;;  %789 = vmatprep.subr.bf16.mxu1 %v825_v1  ;;  %v830_v3 = vld [vmem:[%s268_s6] sm:$0xff]   ;;  %v831_v4 = vld [vmem:[%s268_s6 + $0x10] sm:$0xff]   ;;  %v832_v8 = vld [vmem:[%s268_s6 + $0x8] sm:$0xff]  }
  0x10   : > { %780 = vmatprep.mubr.msk.bf16.mxu0 %vm370_vm0, %v830_v3  ;;  %784 = vmatprep.mubr.msk.bf16.mxu1 %vm370_vm0, %v831_v4  ;;  %v833_v9 = vld [vmem:[%s268_s6 + $0x18] sm:$0xff]  }
  0x12   : > { %771 = vmatpush3.bf16.msra.mxu0 %v825_v1  ;;  %795 = vmatpush3.bf16.msra.mxu1 %v825_v1 }
  0x13   : > { %772 = vmatprep.subr.bf16.mxu0 %v826_v2  ;;  %790 = vmatprep.subr.bf16.mxu1 %v826_v2 }
  0x16   : > { %773 = vmatpush3.bf16.msra.mxu0 %v826_v2  ;;  %796 = vmatpush3.bf16.msra.mxu1 %v826_v2 }
  0x17   : > { %774 = vmatprep.subr.bf16.mxu0 %v827_v5  ;;  %791 = vmatprep.subr.bf16.mxu1 %v827_v5 }
  0x1a   : > { %775 = vmatpush3.bf16.msra.mxu0 %v827_v5  ;;  %797 = vmatpush3.bf16.msra.mxu1 %v827_v5 }
  0x1b   : > { %776 = vmatprep.subr.bf16.mxu0 %v828_v6  ;;  %792 = vmatprep.subr.bf16.mxu1 %v828_v6 }
  0x1e   : > { %777 = vmatpush3.bf16.msra.mxu0 %v828_v6  ;;  %798 = vmatpush3.bf16.msra.mxu1 %v828_v6 }
  0x1f   : > { %778 = vmatprep.subr.bf16.mxu0 %v829_v7  ;;  %793 = vmatprep.subr.bf16.mxu1 %v829_v7 }
  0x22   : > { %779 = vmatpush3.bf16.msra.mxu0 %v829_v7  ;;  %799 = vmatpush3.bf16.msra.mxu1 %v829_v7 }
  0x25   : > { %781 = vmatmul.mubr.msk.bf16.vlgmr.msra.gmra.mxu0 %vm370_vm0, %v832_v8  ;;  %785 = vmatmul.mubr.msk.bf16.vlgmr.msra.gmra.mxu1 %vm370_vm0, %v833_v9 }
  0xe5   : > { %v782_v11 = vpop.f32.mrf.mxu0  ;;  %v786_v12 = vpop.f32.mrf.mxu1 }
  0xe6   : > { %v953_v13 = vadd.f32 %v782_v11, %v719_v10  ;;  %v955_v14 = vadd.f32 %v786_v12, %v719_v10 }
  0xe7   : > { %v417_v15 = vpop.f32.mrf.mxu0  ;;  %v433_v16 = vpop.f32.mrf.mxu1 }
  0xe8   : > { %460 = vadd.xlane.f32.xlu0 %v955_v14  ;;  %452 = vadd.xlane.f32.xlu1 %v953_v13  ;;  %v959_v18 = vadd.f32 %v719_v10, %v417_v15  ;;  %v965_v21 = vadd.f32 %v719_v10, %v433_v16  ;;  %v466_v25 = vmul.f32 %v953_v13, %v953_v13 }
  0xe9   : > { %v783_v17 = vpop.f32.mrf.mxu0  ;;  %v787_v20 = vpop.f32.mrf.mxu1  ;;  %v470_v34 = vmul.f32 %v955_v14, %v955_v14 }
  0xea   : > { %v961_v19 = vadd.f32 %v783_v17, %v719_v10  ;;  %v967_v22 = vadd.f32 %v787_v20, %v719_v10  ;;  %v464_v29 = vmul.f32 %v959_v18, %v959_v18  ;;  %v468_v31 = vmul.f32 %v965_v21, %v965_v21 }
  0xeb   : > { %v436_v23 = vpop.f32.mrf.mxu1  ;;  %v420_v26 = vpop.f32.mrf.mxu0 }
  0xec   : > { %454 = vadd.xlane.f32.xlu1 %v961_v19  ;;  %448 = vadd.xlane.f32.xlu0 %v959_v18  ;;  %v971_v24 = vadd.f32 %v719_v10, %v436_v23  ;;  %v976_v27 = vadd.f32 %v719_v10, %v420_v26  ;;  %v467_v28 = vmul.f32 %v961_v19, %v961_v19 }
  0xed   : > { %v471_v33 = vmul.f32 %v967_v22, %v967_v22 }
  0xee   : > { %v465_v30 = vmul.f32 %v976_v27, %v976_v27  ;;  %v469_v32 = vmul.f32 %v971_v24, %v971_v24 }
  0xf0   : > { %462 = vadd.xlane.f32.xlu1 %v967_v22  ;;  %456 = vadd.xlane.f32.xlu0 %v965_v21 }
  0xf4   : > { %458 = vadd.xlane.f32.xlu1 %v971_v24  ;;  %476 = vadd.xlane.f32.xlu0 %v466_v25 }
  0xf8   : > { %478 = vadd.xlane.f32.xlu1 %v467_v28  ;;  %472 = vadd.xlane.f32.xlu0 %v464_v29 }
  0xfc   : > { %474 = vadd.xlane.f32.xlu1 %v465_v30  ;;  %480 = vadd.xlane.f32.xlu0 %v468_v31 }
 0x100   : > { %482 = vadd.xlane.f32.xlu1 %v469_v32  ;;  %450 = vadd.xlane.f32.xlu0 %v976_v27 }
 0x104   : > { %486 = vadd.xlane.f32.xlu1 %v471_v33  ;;  %484 = vadd.xlane.f32.xlu0 %v470_v34  ;;  %v755_v34 = vld [vmem:[%s1083_s4 + $0x8] sm:$0xff]  }
 0x171   : > { %v461_v35 = vpop.xlane.xlu0 %460  ;;  %v453_v36 = vpop.xlane.xlu1 %452 }
 0x172   : > { %v993_v41 = vmul.f32 0.020833334, %v453_v36  ;;  %v1011_v5 = vmul.f32 0.020833334, %v461_v35 }
 0x174   : > { %v506_v45 = vmul.f32 %v993_v41, %v993_v41  ;;  %v510_v23 = vmul.f32 %v1011_v5, %v1011_v5 }
 0x175   : > { %v455_v37 = vpop.xlane.xlu1 %454  ;;  %v449_v38 = vpop.xlane.xlu0 %448 }
 0x176   : > { %v995_v42 = vmul.f32 0.020833334, %v455_v37  ;;  %v999_v46 = vmul.f32 0.020833334, %v449_v38 }
 0x178   : > { %v507_v49 = vmul.f32 %v995_v42, %v995_v42  ;;  %v504_v52 = vmul.f32 %v999_v46, %v999_v46 }
 0x179   : > { %v463_v39 = vpop.xlane.xlu1 %462  ;;  %v457_v40 = vpop.xlane.xlu0 %456 }
 0x17a   : > { %v1005_v56 = vmul.f32 0.020833334, %v457_v40  ;;  %v1013_v6 = vmul.f32 0.020833334, %v463_v39  ;;  %v530_v39 = vsub.f32 %v953_v13, %v993_v41  ;;  %v740_v13 = vld [vmem:[%s1083_s4] sm:$0xff]  }
 0x17c   : > { %v508_v1 = vmul.f32 %v1005_v56, %v1005_v56  ;;  %v511_v25 = vmul.f32 %v1013_v6, %v1013_v6 }
 0x17d   : > { %v459_v43 = vpop.xlane.xlu1 %458  ;;  %v477_v44 = vpop.xlane.xlu0 %476 }
 0x17e   : > { %v498_v47 = vmul.f32 0.020833334, %v477_v44  ;;  %v1007_v62 = vmul.f32 0.020833334, %v459_v43 }
 0x180   : > { %v514_v48 = vsub.f32 %v498_v47, %v506_v45  ;;  %v509_v10 = vmul.f32 %v1007_v62, %v1007_v62  ;;  %v734_v47 = vld [vmem:[%s1082_s3] ss:$0 sm:$0xff] }
 0x181   : > { %v479_v50 = vpop.xlane.xlu1 %478  ;;  %v473_v51 = vpop.xlane.xlu0 %472 }
 0x182   : > { %v522_v53 = vmax.f32 %v514_v48, 0.0  ;;  %v499_v54 = vmul.f32 0.020833334, %v479_v50  ;;  %v496_v55 = vmul.f32 0.020833334, %v473_v51  ;;  %v745_v48 = vunpack.c.l.bf16 %v755_v34 }
 0x184   : > { %v538_v57 = vadd.f32 1e-05, %v522_v53  ;;  %v515_v58 = vsub.f32 %v499_v54, %v507_v49  ;;  %v512_v59 = vsub.f32 %v496_v55, %v504_v52  ;;  %v531_v52 = vsub.f32 %v961_v19, %v995_v42 }
 0x185   : > { %v475_v60 = vpop.xlane.xlu1 %474  ;;  %v481_v61 = vpop.xlane.xlu0 %480  ;;  %v528_v54 = vsub.f32 %v959_v18, %v999_v46  ;;  %v746_v19 = vunpack.c.h.bf16 %v755_v34 }
 0x186   : > { %834 = vrsqrt.f32 %v538_v57  ;;  %v523_v63 = vmax.f32 %v515_v58, 0.0  ;;  %v520_v0 = vmax.f32 %v512_v59, 0.0  ;;  %v500_v2 = vmul.f32 0.020833334, %v481_v61  ;;  %v756_v61 = vld [vmem:[%s1083_s4 + $0x10] sm:$0xff]  }
 0x187   : > { %v497_v16 = vmul.f32 0.020833334, %v475_v60  ;;  %v741_v59 = vunpack.c.l.bf16 %v740_v13 }
 0x188   : > { %v539_v3 = vadd.f32 1e-05, %v523_v63  ;;  %v536_v4 = vadd.f32 1e-05, %v520_v0  ;;  %v516_v7 = vsub.f32 %v500_v2, %v508_v1  ;;  %v532_v63 = vsub.f32 %v965_v21, %v1005_v56 }
 0x189   : > { %v483_v8 = vpop.xlane.xlu1 %482  ;;  %v451_v9 = vpop.xlane.xlu0 %450  ;;  %v749_v1 = vunpack.c.l.bf16 %v756_v61 }
 0x18a   : > { %836 = vrsqrt.f32 %v539_v3  ;;  %v501_v11 = vmul.f32 0.020833334, %v483_v8  ;;  %v1017_v12 = vmul.f32 0.020833334, %v451_v9  ;;  %v524_v15 = vmax.f32 %v516_v7, 0.0 }
 0x18b   : > { %838 = vrsqrt.f32 %v536_v4  ;;  %v533_v4 = vsub.f32 %v971_v24, %v1007_v62  ;;  %v750_v9 = vunpack.c.h.bf16 %v756_v61  ;;  %v535_v24 = vsub.f32 %v967_v22, %v1013_v6 }
 0x18c   : > { %v517_v17 = vsub.f32 %v501_v11, %v509_v10  ;;  %v505_v20 = vmul.f32 %v1017_v12, %v1017_v12  ;;  %v540_v26 = vadd.f32 1e-05, %v524_v15  ;;  %v529_v11 = vsub.f32 %v976_v27, %v1017_v12  ;;  %v757_v15 = vld [vmem:[%s1083_s4 + $0x18] sm:$0xff]  }
 0x18d   : > { %v487_v28 = vpop.xlane.xlu1 %486  ;;  %v485_v29 = vpop.xlane.xlu0 %484 }
 0x18e   : > { %v525_v30 = vmax.f32 %v517_v17, 0.0  ;;  %v513_v31 = vsub.f32 %v497_v16, %v505_v20  ;;  %v503_v32 = vmul.f32 0.020833334, %v487_v28  ;;  %v502_v33 = vmul.f32 0.020833334, %v485_v29 }
 0x18f   : > { %840 = vrsqrt.f32 %v540_v26  ;;  %v742_v16 = vunpack.c.h.bf16 %v740_v13  ;;  %v754_v26 = vunpack.c.h.bf16 %v757_v15  ;;  %v753_v29 = vunpack.c.l.bf16 %v757_v15 }
 0x190   : > { %v541_v35 = vadd.f32 1e-05, %v525_v30  ;;  %v521_v36 = vmax.f32 %v513_v31, 0.0  ;;  %v519_v37 = vsub.f32 %v503_v32, %v511_v25  ;;  %v518_v38 = vsub.f32 %v502_v33, %v510_v23 }
 0x191   : > { %v534_v23 = vsub.f32 %v955_v14, %v1011_v5 }
 0x192   : > { %842 = vrsqrt.f32 %v541_v35  ;;  %v537_v40 = vadd.f32 1e-05, %v521_v36  ;;  %v527_v43 = vmax.f32 %v519_v37, 0.0  ;;  %v526_v44 = vmax.f32 %v518_v38, 0.0 }
 0x193   : > { %v835_v45 = vpop.eup %834 }
 0x194   : > { %v554_v49 = vmul.f32 %v835_v45, %v530_v39  ;;  %844 = vrsqrt.f32 %v537_v40  ;;  %v543_v50 = vadd.f32 1e-05, %v527_v43  ;;  %v542_v51 = vadd.f32 1e-05, %v526_v44 }
 0x196   : > { %v569_v53 = vmul.f32 %v734_v47, %v554_v49  ;;  %846 = vrsqrt.f32 %v543_v50 }
 0x197   : > { %v837_v41 = vpop.eup %836  ;;  %848 = vrsqrt.f32 %v542_v51 }
 0x198   : > { %v839_v55 = vpop.eup %838  ;;  %v593_v57 = vadd.f32 %v745_v48, %v569_v53  ;;  %v555_v42 = vmul.f32 %v837_v41, %v531_v52 }
 0x199   : > { %v552_v58 = vmul.f32 %v839_v55, %v528_v54 }
 0x19a   : > { %601 = vst [vmem:[%s1042_s28 + $0x10] sm:$0xff] %v593_v57  ;;  %v570_v60 = vmul.f32 %v734_v47, %v555_v42 }
 0x19b   : > { %v567_v0 = vmul.f32 %v734_v47, %v552_v58 }
 0x19c   : > { %v841_v18 = vpop.eup %840  ;;  %v594_v46 = vadd.f32 %v746_v19, %v570_v60 }
 0x19d   : > { %v556_v2 = vmul.f32 %v841_v18, %v532_v63  ;;  %v591_v3 = vadd.f32 %v741_v59, %v567_v0 }
 0x19e   : > { %602 = vst [vmem:[%s1042_s28 + $0x18] sm:$0xff] %v594_v46 }
 0x19f   : > { %v843_v7 = vpop.eup %842  ;;  %v571_v8 = vmul.f32 %v734_v47, %v556_v2  ;;  %599 = vst [vmem:[%s1042_s28] sm:$0xff] %v591_v3 }
 0x1a0   : > { %v557_v10 = vmul.f32 %v843_v7, %v533_v4 }
 0x1a1   : > { %v845_v21 = vpop.eup %844  ;;  %v595_v56 = vadd.f32 %v749_v1, %v571_v8 }
 0x1a2   : > { %v572_v62 = vmul.f32 %v734_v47, %v557_v10  ;;  %v553_v17 = vmul.f32 %v845_v21, %v529_v11 }
 0x1a3   : > { %v847_v20 = vpop.eup %846  ;;  %603 = vst [vmem:[%s1042_s28 + $0x20] sm:$0xff] %v595_v56 }
 0x1a4   : > { %v849_v27 = vpop.eup %848  ;;  %v596_v12 = vadd.f32 %v750_v9, %v572_v62  ;;  %v568_v25 = vmul.f32 %v734_v47, %v553_v17  ;;  %v559_v28 = vmul.f32 %v847_v20, %v535_v24 }
 0x1a5   : > { %v558_v30 = vmul.f32 %v849_v27, %v534_v23 }
 0x1a6   : > { %604 = vst [vmem:[%s1042_s28 + $0x28] sm:$0xff] %v596_v12  ;;  %v592_v22 = vadd.f32 %v742_v16, %v568_v25  ;;  %v574_v6 = vmul.f32 %v734_v47, %v559_v28 }
 0x1a7   : > { %v573_v31 = vmul.f32 %v734_v47, %v558_v30 }
 0x1a8   : > { %600 = vst [vmem:[%s1042_s28 + $0x8] sm:$0xff] %v592_v22  ;;  %v598_v32 = vadd.f32 %v754_v26, %v574_v6 }
 0x1a9   : > { %v597_v33 = vadd.f32 %v753_v29, %v573_v31 }
 0x1aa   : > { %606 = vst [vmem:[%s1042_s28 + $0x38] sm:$0xff] %v598_v32 }
 0x1ab   : > { %605 = vst [vmem:[%s1042_s28 + $0x30] sm:$0xff] %v597_v33 }
 0x1ac PF: > { %s15_s20 = sadd.s32 1, %s872_s20   ;;  %s1085_s18 = smov %s868_s19 }
 0x1ad   : > { %p12_p5 = scmp.ge.s32.totalorder %s15_s20, 4   ;;  %s1086_s19 = smov %s1088_s21 }
 0x1af   :  { %14 = sbr.rel (!%p12_p5) target bundleno = 2 (0x2), region = 73 }

</bundles_post_ra>
